<compile_context>
chip_gen: v7x
topology: tpu7x:2x2x1
jax: 0.10.0
libtpu: 0.0.40
codegen_flags: <defaults>
</compile_context>

<pallas_src>
import jax
import jax.numpy as jnp
from jax.experimental import pallas as pl
from jax.experimental.pallas import tpu as pltpu

_SUBLANE = 8
_LANE = 128
_TARGET_W_TILE_BYTES = 8 * 1024 * 1024     # ~8 MiB weight tile (16 MiB double-buffered)
_VMEM_LIMIT_CAP = 48 * 1024 * 1024         # leave headroom under v7x's 64 MiB VMEM


def _round_up(v, m):
    return ((v + m - 1) // m) * m


def _pick_tile_n(n_pad, k_pad, w_itemsize):
    """Largest lane-multiple divisor of n_pad under a byte budget; also keeps
    >= 2 N tiles when possible so v7x's two TensorCores both stream weights."""
    cap = max(_LANE, (_TARGET_W_TILE_BYTES // max(1, k_pad * w_itemsize)) // _LANE * _LANE)
    if n_pad >= 2 * _LANE:
        cap = min(cap, max(_LANE, (n_pad // 2) // _LANE * _LANE))
    cap = min(cap, n_pad)
    best = _LANE
    for t in range(_LANE, cap + 1, _LANE):
        if n_pad % t == 0:
            best = t
    return best


def _fused_linear_kernel(x_ref, w_ref, b_ref, y_ref):
    # Whole K in one block: y = x @ W_tile + b, written once.  No accumulator
    # scratch, no init/finalize phases.  f32 MXU accumulation + f32 bias add.
    y_ref[...] = (
        jnp.dot(x_ref[...], w_ref[...], preferred_element_type=jnp.float32)
        + b_ref[...]
    ).astype(y_ref.dtype)


def fused_parallel_linear(x_rows, w_all, b_all):
    """y = x_rows @ w_all + b_all for all (1 + num_pruned) Linears at once.

    x_rows: (8, Kp)  padded activations (only row 0 meaningful), compute dtype
    w_all:  (Kp, Np) pre-transposed, module-concatenated weights (compute dtype)
    b_all:  (1, Np)  f32 biases
    returns (8, Np)  f32
    """
    S8, Kp = x_rows.shape
    Np = w_all.shape[1]
    w_itemsize = jnp.dtype(w_all.dtype).itemsize

    tn = _pick_tile_n(Np, Kp, w_itemsize)
    grid = (Np // tn,)

    # Double-buffered VMEM footprint (weights dominate); raise the scoped VMEM
    # limit to match, capped well under v7x's 64 MiB physical VMEM.
    # TODO(synk): add a K-reduction grid axis for in_features so large that even
    # a (Kp, 128) bf16 weight tile blows the VMEM budget (Kp >~ 98k).
    need = (2 * Kp * tn * w_itemsize            # weight tiles
            + 2 * S8 * Kp * w_itemsize          # resident activations
            + 2 * S8 * tn * 4                   # output tiles
            + 2 * tn * 4)                       # bias tiles
    vmem_limit = int(min(max(need + (4 << 20), 32 << 20), _VMEM_LIMIT_CAP))

    return pl.pallas_call(
        _fused_linear_kernel,
        out_shape=jax.ShapeDtypeStruct((S8, Np), jnp.float32),
        grid_spec=pltpu.PrefetchScalarGridSpec(
            num_scalar_prefetch=0,
            grid=grid,
            in_specs=[
                pl.BlockSpec((S8, Kp), lambda n: (0, 0)),   # activations, fully resident
                pl.BlockSpec((Kp, tn), lambda n: (0, n)),   # streamed weight tile
                pl.BlockSpec((1, tn), lambda n: (0, n)),    # bias tile
            ],
            out_specs=pl.BlockSpec((S8, tn), lambda n: (0, n)),
        ),
        compiler_params=pltpu.CompilerParams(
            dimension_semantics=("parallel",),
            vmem_limit_bytes=vmem_limit,
        ),
    )(x_rows, w_all, b_all)


class MultipleParallelFinetuningBlock:
    """JAX/Pallas port of the PyTorch wrapper for module_type == 'Linear'.

    original_module / entries of pruned_module_list are (weight, bias) tuples
    standing in for nn.Linear (weight: (O, H), bias: (O,)).  forward(x) returns
    original_module(x)[0] (row 0 of the Linear output) and stores
    out_original / out_pruned_list, matching the PyTorch module.
    """

    def __init__(self, original_module, pruned_module_list, module_type,
                 head_mask_list, compute_dtype=jnp.bfloat16):
        assert isinstance(pruned_module_list, list)
        assert module_type in ("Linear", "MultiheadAttention"), \
            "Module must be Linear or MultiheadAttention"
        # TODO(synk): MultiheadAttention branch (head_mask_list) is not implemented here.
        assert module_type == "Linear"
        self.module_type = module_type
        self.original_module = original_module
        self.pruned_module_list = pruned_module_list
        self.out_original = None
        self.out_pruned_list = []

        w0, b0 = original_module
        ws = [w0] + [w for (w, _) in pruned_module_list]
        bs = [b0] + [b for (_, b) in pruned_module_list]
        w_stack = jnp.stack(ws, axis=0)                  # (M, O, H)
        b_stack = jnp.stack(bs, axis=0)                  # (M, O)
        M, O, H = w_stack.shape
        self.num_modules = M
        self.out_features = O
        self.in_features = H
        # bf16 weights/activations (f32 accumulation + f32 bias): HBM-bound
        # weight stream is the dominant cost, so narrower weights ~halve time.
        self._compute_dtype = compute_dtype

        # Fuse module axis into N and pre-transpose so the contraction is
        # x(last-dim) vs W(first-dim): W_all[h, m*O + o] = w_m[o, h].
        w_all = jnp.transpose(w_stack, (2, 0, 1)).reshape(H, M * O)
        b_all = b_stack.reshape(1, M * O)

        Kp = _round_up(H, _LANE)
        Np = _round_up(M * O, _LANE)
        self._Kp, self._Np = Kp, Np
        self._w_all = (jnp.zeros((Kp, Np), self._compute_dtype)
                       .at[:H, :M * O].set(w_all.astype(self._compute_dtype)))
        self._b_all = (jnp.zeros((1, Np), jnp.float32)
                       .at[:, :M * O].set(b_all.astype(jnp.float32)))

        cdt = self._compute_dtype

        @jax.jit
        def _fwd(x, w_all_dev, b_all_dev):
            # Pad row 0 of x into a single (8, Kp) sublane tile (one fused pad).
            x_rows = jnp.pad(x[0].astype(cdt)[None, :],
                             ((0, _SUBLANE - 1), (0, Kp - H)))
            y = fused_parallel_linear(x_rows, w_all_dev, b_all_dev)   # (8, Np) f32
            return y[0, :M * O].reshape(M, O).astype(x.dtype)         # per-module z[0]

        self._fwd = _fwd

    def forward(self, x):
        row0 = self._fwd(x, self._w_all, self._b_all)
        self.out_original = row0[0]
        self.out_pruned_list = [row0[i] for i in range(1, self.num_modules)]
        return row0[0]

    __call__ = forward


if __name__ == "__main__":
    key = jax.random.PRNGKey(0)
    S, H, O = 8, 32, 32          # seq, hidden (in_features), out_features
    num_pruned = 3
    k_x, k_w, k_b, *k_pruned = jax.random.split(key, 3 + num_pruned)

    x = jax.random.normal(k_x, (S, H), dtype=jnp.float32)
    w_orig = jax.random.normal(k_w, (O, H), dtype=jnp.float32) * 0.1
    b_orig = jax.random.normal(k_b, (O,), dtype=jnp.float32) * 0.1

    pruned_modules = []
    for i, kp in enumerate(k_pruned):
        kw, kb = jax.random.split(kp)
        w = jax.random.normal(kw, (O, H), dtype=jnp.float32) * 0.1
        b = jax.random.normal(kb, (O,), dtype=jnp.float32) * 0.1
        # emulate structured pruning: zero the last (i+1)*8 output units
        mask = (jnp.arange(O) < (O - 8 * (i + 1))).astype(jnp.float32)
        pruned_modules.append((w * mask[:, None], b * mask))

    block = MultipleParallelFinetuningBlock(
        (w_orig, b_orig), pruned_modules, "Linear", None)

    out = block(x)
    jax.block_until_ready(out)

    # --- reference checks --------------------------------------------------
    def _bf16(v):
        return v.astype(jnp.bfloat16).astype(jnp.float32)

    # Tight check against a bf16-rounded reference (same quantization as the kernel).
    ref_orig_q = _bf16(x[0]) @ _bf16(w_orig).T + b_orig
    assert jnp.allclose(out, ref_orig_q, atol=1e-4, rtol=1e-4), "original output mismatch"
    assert jnp.allclose(block.out_original, ref_orig_q, atol=1e-4, rtol=1e-4)
    for (w, b), got in zip(pruned_modules, block.out_pruned_list):
        ref_q = _bf16(x[0]) @ _bf16(w).T + b
        assert jnp.allclose(got, ref_q, atol=1e-4, rtol=1e-4), "pruned output mismatch"

    # Loose check against the exact f32 module semantics (bf16 rounding only).
    ref_orig_f32 = x @ w_orig.T + b_orig
    assert jnp.allclose(out, ref_orig_f32[0], atol=3e-2, rtol=3e-2), "f32 semantics drift"
    assert len(block.out_pruned_list) == num_pruned

    print("KERNEL_OK")
</pallas_src>

<mosaic_0001>
module attributes {stable_mosaic.version = 11 : i64} {
  func.func @_fused_linear_kernel(%arg0: i32, %arg1: memref<8x128xbf16, #tpu.memory_space<vmem>>, %arg2: memref<128x128xbf16, #tpu.memory_space<vmem>>, %arg3: memref<1x128xf32, #tpu.memory_space<vmem>>, %arg4: memref<8x128xf32, #tpu.memory_space<vmem>>) attributes {dimension_semantics = [#tpu.dimension_semantics<parallel>], iteration_bounds = array<i64: 1>, scalar_prefetch = 0 : i64, scratch_operands = 0 : i64, tpu.core_type = #tpu.core_type<tc>, window_params = [{pipeline_mode = #tpu.pipeline_mode<synchronous>, transform_indices = @transform_0, window_bounds = array<i64: 8, 128>}, {transform_indices = @transform_1, window_bounds = array<i64: 128, 128>}, {transform_indices = @transform_2, window_bounds = array<i64: 1, 128>}, {transform_indices = @transform_3, window_bounds = array<i64: 8, 128>}]} {
    %c0 = arith.constant 0 : index
    %c0_0 = arith.constant 0 : index
    %0 = vector.load %arg1[%c0, %c0_0] : memref<8x128xbf16, #tpu.memory_space<vmem>>, vector<8x128xbf16>
    %c0_1 = arith.constant 0 : index
    %c0_2 = arith.constant 0 : index
    %1 = vector.load %arg2[%c0_1, %c0_2] : memref<128x128xbf16, #tpu.memory_space<vmem>>, vector<128x128xbf16>
    %cst = arith.constant dense<0.000000e+00> : vector<8x128xf32>
    %2 = tpu.matmul %0, %1, %cst {dimension_numbers = #tpu.dot_dimension_numbers<[1], [0], [0], [1], [0, 0, 1, 1], [], []>} : vector<8x128xbf16>, vector<128x128xbf16>, vector<8x128xf32> -> vector<8x128xf32>
    %c0_3 = arith.constant 0 : index
    %c0_4 = arith.constant 0 : index
    %3 = vector.load %arg3[%c0_3, %c0_4] : memref<1x128xf32, #tpu.memory_space<vmem>>, vector<1x128xf32>
    %4 = vector.broadcast %3 : vector<1x128xf32> to vector<8x128xf32>
    %5 = arith.addf %2, %4 : vector<8x128xf32>
    %c0_5 = arith.constant 0 : index
    %c0_6 = arith.constant 0 : index
    %6 = vector.load %arg4[%c0_5, %c0_6] : memref<8x128xf32, #tpu.memory_space<vmem>>, vector<8x128xf32>
    tpu.vector_store %arg4[%c0_5, %c0_6], %5 {strides = array<i32>} : memref<8x128xf32, #tpu.memory_space<vmem>>, vector<8x128xf32>,
    return
  }
  func.func @transform_0(%arg0: i32) -> (i32, i32) {
    %c0_i32 = arith.constant 0 : i32
    %c0_i32_0 = arith.constant 0 : i32
    %c0_i32_1 = arith.constant 0 : i32
    return %c0_i32, %c0_i32_0 : i32, i32
  }
  func.func @transform_1(%arg0: i32) -> (i32, i32) {
    %c0_i32 = arith.constant 0 : i32
    %c0_i32_0 = arith.constant 0 : i32
    return %c0_i32, %arg0 : i32, i32
  }
  func.func @transform_2(%arg0: i32) -> (i32, i32) {
    %c0_i32 = arith.constant 0 : i32
    %c0_i32_0 = arith.constant 0 : i32
    return %c0_i32, %arg0 : i32, i32
  }
  func.func @transform_3(%arg0: i32) -> (i32, i32) {
    %c0_i32 = arith.constant 0 : i32
    %c0_i32_0 = arith.constant 0 : i32
    return %c0_i32, %arg0 : i32, i32
  }
}

</mosaic_0001>

<bundles_post_ra>
// kernel: squeeze.3
= control target key start
LH: loop header
LB: loop body
LE: loop exit
PB: predicated region body
PF: predicated region fallthrough
CT: control target
= control target key end

     0   :  { %s101_s0 = inlined_call_operand.vmem [shape: f32[128], index: 0, kind: input, shape index: {}]   ;;  %s102_s1 = inlined_call_operand.hbm [shape: f32[4,32], index: 1, kind: output, shape index: {}]  }
   0x1   :  { %v5_v0 = vld [vmem:[%s101_s0] sm:$0x1] }
   0x2   :  { %6 = vst [vmem:[#allocation3] sm:$0x1] %v5_v0 }
   0x3   :  { %2 = vsyncpa [#allocation1], 0  ;;  %s72_s0 = smov 96   ;;  %s73_s8 = smov 32   ;;  %vm8_vm0 = vcmask 261120  }
   0x4   :  { %s74_s9 = smov 64   ;;  %s75_s10 = smov [#allocation0]  }
   0x5   :  { %s38_s11 = sshll.u32 %s75_s10, 4  ;;  %s39_s11 = int_to_ptr.vmem [resolvable:$true] %s38_s11 }
   0x6   :  { %s48_s12 = scalar_lea.vmem %s39_s11, 64  ;;  %p53_p1 = scmp.lt.s32.totalorder %s39_s11, %s39_s11 }
   0x7   :  { %p49_p0 = scmp.ne.s32.totalorder %s39_s11, %s48_s12  ;;  %p54_p2 = scmp.lt.s32.totalorder %s48_s12, %s48_s12 }
   0x9   :  { %v10_v1 = vld [vmem:[#allocation3] sm:$0x1]   ;;  %p55_p3 = por %p54_p2, %p53_p1 }
   0xa   :  { %v22_v2 = vld [vmem:[#allocation3] sm:$0x1]   ;;  %11 = vrot.lane.b32.xlu0 %v10_v1, %s72_s0 }
   0xb   :  { %23 = vrot.lane.b32.xlu1 %v22_v2, %s73_s8  ;;  %v7_v3 = vld [vmem:[#allocation3] sm:$0x1]   ;;  %p56_p4 = pnand %p55_p3, %p49_p0 }
   0xc   :  { %v16_v4 = vld [vmem:[#allocation3] sm:$0x1]   ;;  %9 = vst.msk [vmem:[#allocation2] sm:$0x1] %vm8_vm0, %v7_v3  }
   0xe   :  { %17 = vrot.lane.b32.xlu0 %v16_v4, %s74_s9 }
  0x7c   :  { %v12_v5 = vpop.permute.xlu0 %11  }
  0x7d   :  { %v24_v6 = vpop.permute.xlu1 %23   ;;  %15 = vst.msk [vmem:[#allocation2 + $0x1] sm:$0x1] %vm8_vm0, %v12_v5  }
  0x7e   :  { %27 = vst.msk [vmem:[#allocation2 + $0x3] sm:$0x1] %vm8_vm0, %v24_v6  }
  0x80   :  { %v18_v7 = vpop.permute.xlu0 %17  }
  0x81   :  { %21 = vst.msk [vmem:[#allocation2 + $0x2] sm:$0x1] %vm8_vm0, %v18_v7  }
  0x88   :  { %v31_v8 = vld [vmem:[#allocation2] sm:$0xf] }
  0x89   :  { %33 = vst [vmem:[#allocation0] sm:$0xf] %v31_v8 }
  0x8a   :  { %59 = shalt.err (!%p56_p4)
}
  0x8b   :  { %s60_s15 = scalar_lea.hbm %s102_s1, 64 }
  0x8c   :  { %p61_p5 = scmp.ne.s32.totalorder %s102_s1, %s60_s15  ;;  %p64_p6 = scmp.lt.u32.totalorder %s60_s15, %s102_s1 }
  0x8e   :  { %p66_p7 = pnand %p64_p6, %p61_p5 }
  0x90   :  { %69 = shalt.err (!%p66_p7)
}
  0x91   :  { %41 = dma.vmem_to_hbm [thread:$0]  %s39_s11, 64, %s102_s1, [#allocation1]  }
  0x92   :  { %70 = dma.done.wait [#allocation1], 64  }
  0x93   :  { %71 = vsyncadd [#allocation1], 4294967232 }
  0x94   :  { %43 = vsyncpa [#allocation1], 1 }

// kernel: _fwd.1
= control target key start
LH: loop header
LB: loop body
LE: loop exit
PB: predicated region body
PF: predicated region fallthrough
CT: control target
= control target key end

     0   :  { %8 = vsyncpa [#allocation3], 0  ;;  %s222_s12 = smov [#allocation2]   ;;  %s268_s0 = inlined_call_operand.vmem [shape: bf16[8,128], index: 0, kind: input, shape index: {}]   ;;  %s269_s1 = inlined_call_operand.hbm [shape: bf16[128,128], index: 1, kind: input, shape index: {}]   ;;  %s270_s2 = inlined_call_operand.vmem [shape: f32[1,128], index: 2, kind: input, shape index: {}]   ;;  %s271_s3 = inlined_call_operand.vmem [shape: f32[8,128], index: 3, kind: output, shape index: {}]  }
   0x1   :  { %s16_s13 = sshll.u32 %s222_s12, 4  ;;  %s198_s16 = scalar_lea.hbm %s269_s1, 1024  ;;  %s17_s13 = int_to_ptr.vmem [resolvable:$true] %s16_s13 }
   0x2   :  { %p199_p0 = scmp.ne.s32.totalorder %s269_s1, %s198_s16  ;;  %p202_p1 = scmp.lt.u32.totalorder %s198_s16, %s269_s1 }
   0x4   :  { %p204_p2 = pnand %p202_p1, %p199_p0 }
   0x6   :  { %207 = shalt.err (!%p204_p2)
}
   0x7   :  { %s208_s21 = scalar_lea.vmem %s17_s13, 1024  ;;  %p213_p4 = scmp.lt.s32.totalorder %s17_s13, %s17_s13 }
   0x8   :  { %p209_p3 = scmp.ne.s32.totalorder %s17_s13, %s208_s21  ;;  %p214_p5 = scmp.lt.s32.totalorder %s208_s21, %s208_s21 }
   0xa   :  { %p215_p6 = por %p214_p5, %p213_p4 }
   0xc   :  { %p216_p7 = pnand %p215_p6, %p209_p3 }
   0xe   :  { %219 = shalt.err (!%p216_p7)
}
   0xf   :  { %s223_s22 = smov 64   ;;  %s224_s23 = smov 4  }
  0x10   :  { %22 = dma.hbm_to_vmem [thread:$0]  %s269_s1, 1024, %s17_s13, [#allocation3], %s223_s22, %s223_s22, %s224_s23  }
  0x11   :  { %220 = dma.done.wait [#allocation3], 1024  }
  0x12   :  { %221 = vsyncadd [#allocation3], 4294966272  ;;  %v225_v0 = vmov 0.0   ;;  %vm226_vm0 = vmmov 0   ;;  %v190_v1 = vld [vmem:[#allocation2] sm:$0xff]   ;;  %v191_v2 = vld [vmem:[#allocation2 + $0x8] sm:$0xff]  }
  0x13   :  { %165 = vmatprep.subr.bf16.mxu0 %v225_v0  ;;  %181 = vmatprep.mubr.msk.bf16.mxu0 %vm226_vm0, %v225_v0  ;;  %v192_v3 = vld [vmem:[#allocation2 + $0x10] sm:$0xff]   ;;  %v193_v4 = vld [vmem:[#allocation2 + $0x18] sm:$0xff]   ;;  %v194_v5 = vld [vmem:[#allocation2 + $0x20] sm:$0xff]  }
  0x14   :  { %166 = vmatpush3.bf16.msra.mxu0 %v190_v1  ;;  %v195_v6 = vld [vmem:[#allocation2 + $0x28] sm:$0xff]   ;;  %v196_v7 = vld [vmem:[#allocation2 + $0x30] sm:$0xff]   ;;  %v197_v8 = vld [vmem:[#allocation2 + $0x38] sm:$0xff]  }
  0x15   :  { %167 = vmatprep.subr.bf16.mxu0 %v225_v0  ;;  %v29_v9 = vld [vmem:[%s268_s0] sm:$0xf] }
  0x16   :  { %v147_v10 = vld [vmem:[%s270_s2] ss:$0 sm:$0xff] }
  0x18   :  { %168 = vmatpush3.bf16.msra.mxu0 %v191_v2 }
  0x19   :  { %169 = vmatprep.subr.bf16.mxu0 %v225_v0 }
  0x1c   :  { %170 = vmatpush3.bf16.msra.mxu0 %v192_v3 }
  0x1d   :  { %171 = vmatprep.subr.bf16.mxu0 %v225_v0 }
  0x20   :  { %172 = vmatpush3.bf16.msra.mxu0 %v193_v4 }
  0x21   :  { %173 = vmatprep.subr.bf16.mxu0 %v225_v0 }
  0x24   :  { %174 = vmatpush3.bf16.msra.mxu0 %v194_v5 }
  0x25   :  { %175 = vmatprep.subr.bf16.mxu0 %v225_v0 }
  0x28   :  { %176 = vmatpush3.bf16.msra.mxu0 %v195_v6 }
  0x29   :  { %177 = vmatprep.subr.bf16.mxu0 %v225_v0 }
  0x2c   :  { %178 = vmatpush3.bf16.msra.mxu0 %v196_v7 }
  0x2d   :  { %179 = vmatprep.subr.bf16.mxu0 %v225_v0 }
  0x30   :  { %180 = vmatpush3.bf16.msra.mxu0 %v197_v8 }
  0x33   :  { %182 = vmatmul.mubr.bf16.vlgmr.msra.gmra.mrb[0].mxu0 %v29_v9 }
 0x106   :  { %v135_v11 = vpop.f32.mrb[0].mxu0 }
 0x107   :  { %v136_v12 = vadd.f32 %v147_v10, %v135_v11  ;;  %v183_v13 = vpop.f32.mrb[1].mxu0 }
 0x108   :  { %v138_v14 = vpop.f32.mrb[2].mxu0 }
 0x109   :  { %141 = vst [vmem:[%s271_s3] sm:$0xff] %v136_v12  ;;  %v184_v15 = vpop.f32.mrb[3].mxu0 }
 0x10a   :  { %146 = vsyncpa [#allocation3], 1 }

</bundles_post_ra>
